<compile_context>
chip_gen: v7x
topology: tpu7x:2x2x1
jax: 0.10.0
libtpu: 0.0.40
codegen_flags: <defaults>
</compile_context>

<pallas_src>
import functools
import math

import jax
import jax.numpy as jnp
from jax.experimental import pallas as pl
from jax.experimental.pallas import tpu as pltpu


# --------------------------------------------------------------------------
# tiling helpers
# --------------------------------------------------------------------------

def _pick_tile(n, target, align):
    """Largest tile <= target that divides n and is align-aligned, else n.

    NOTE: falls back to the full dimension when no aligned divisor exists;
    fine at the model sizes used here (all dims are small)."""
    if n <= target:
        return n
    t = (target // align) * align
    while t >= align:
        if n % t == 0:
            return t
        t -= align
    return n


def _batch_tile(b, per_bytes, budget=4 * 1024 * 1024):
    """Largest divisor of b whose block stays under a modest VMEM budget."""
    for t in range(b, 0, -1):
        if b % t == 0 and t * per_bytes <= budget:
            return t
    return 1


# --------------------------------------------------------------------------
# Pallas kernels
# --------------------------------------------------------------------------

@functools.lru_cache(maxsize=None)
def _matmul_fn(M, K, N, act, out_dtype):
    """out = act(A @ B + bias). Operands cast to bf16 in-kernel, f32 accum."""
    tm = _pick_tile(M, 512, 8)
    tk = _pick_tile(K, 512, 128)
    tn = _pick_tile(N, 512, 128)
    gm, gn, gk = M // tm, N // tn, K // tk

    def kernel(a_ref, b_ref, bias_ref, o_ref, acc_ref):
        @pl.when(pl.program_id(2) == 0)
        def _():
            acc_ref[...] = jnp.zeros_like(acc_ref)

        acc_ref[...] += jnp.dot(a_ref[...].astype(jnp.bfloat16),
                                b_ref[...].astype(jnp.bfloat16),
                                preferred_element_type=jnp.float32)

        @pl.when(pl.program_id(2) == pl.num_programs(2) - 1)
        def _():
            out = acc_ref[...] + bias_ref[...]
            if act == "relu":
                out = jnp.maximum(out, 0.0)
            o_ref[...] = out.astype(o_ref.dtype)

    return pl.pallas_call(
        kernel,
        out_shape=jax.ShapeDtypeStruct((M, N), out_dtype),
        grid=(gm, gn, gk),
        in_specs=[
            pl.BlockSpec((tm, tk), lambda i, j, k: (i, k)),
            pl.BlockSpec((tk, tn), lambda i, j, k: (k, j)),
            pl.BlockSpec((1, tn), lambda i, j, k: (0, j)),
        ],
        out_specs=pl.BlockSpec((tm, tn), lambda i, j, k: (i, j)),
        scratch_shapes=[pltpu.VMEM((tm, tn), jnp.float32)],
        compiler_params=pltpu.CompilerParams(
            dimension_semantics=("parallel", "parallel", "arbitrary")),
    )


def matmul_bias_act(a, w, bias, act="none", out_dtype=jnp.float32):
    M, K = a.shape
    N = w.shape[1]
    return _matmul_fn(M, K, N, act, out_dtype)(a, w, bias)


@functools.lru_cache(maxsize=None)
def _ln_matmul_fn(M, K, N, eps, out_dtype):
    """Fused row-LayerNorm prologue + matmul: out = LN(x) @ W + b."""
    tm = _pick_tile(M, 512, 8)
    tn = _pick_tile(N, 512, 128)
    gm, gn = M // tm, N // tn

    def kernel(x_ref, g_ref, bt_ref, w_ref, b_ref, o_ref):
        x = x_ref[...].astype(jnp.float32)
        mu = jnp.mean(x, axis=-1, keepdims=True)
        xc = x - mu
        var = jnp.mean(xc * xc, axis=-1, keepdims=True)
        xn = xc * jax.lax.rsqrt(var + eps) * g_ref[...] + bt_ref[...]
        out = jnp.dot(xn.astype(jnp.bfloat16), w_ref[...].astype(jnp.bfloat16),
                      preferred_element_type=jnp.float32) + b_ref[...]
        o_ref[...] = out.astype(o_ref.dtype)

    return pl.pallas_call(
        kernel,
        out_shape=jax.ShapeDtypeStruct((M, N), out_dtype),
        grid=(gm, gn),
        in_specs=[
            pl.BlockSpec((tm, K), lambda i, j: (i, 0)),
            pl.BlockSpec((1, K), lambda i, j: (0, 0)),
            pl.BlockSpec((1, K), lambda i, j: (0, 0)),
            pl.BlockSpec((K, tn), lambda i, j: (0, j)),
            pl.BlockSpec((1, tn), lambda i, j: (0, j)),
        ],
        out_specs=pl.BlockSpec((tm, tn), lambda i, j: (i, j)),
        compiler_params=pltpu.CompilerParams(
            dimension_semantics=("parallel", "parallel")),
    )


def layernorm_matmul(x2d, ln, w, bias, out_dtype=jnp.bfloat16, eps=1e-5):
    M, K = x2d.shape
    N = w.shape[1]
    return _ln_matmul_fn(M, K, N, eps, out_dtype)(x2d, ln["g"], ln["b"], w, bias)


@functools.lru_cache(maxsize=None)
def _conv_fn(B, H, W, Cin, Cout, K, act, out_dtype):
    """Dense KxK conv on padded NHWC input: in-VMEM im2col then one MXU matmul
    with contraction depth K*K*Cin per batch item."""
    Hp, Wp = H + K - 1, W + K - 1

    def kernel(x_ref, w_ref, b_ref, o_ref):
        x = x_ref[0]                                            # (Hp, Wp, Cin)
        cols = []
        for i in range(K):
            for j in range(K):
                cols.append(x[i:i + H, j:j + W, :].reshape(H * W, Cin))
        a = jnp.concatenate(cols, axis=-1).astype(jnp.bfloat16)  # (H*W, K*K*Cin)
        out = jnp.dot(a, w_ref[...].astype(jnp.bfloat16),
                      preferred_element_type=jnp.float32) + b_ref[...]
        if act == "relu":
            out = jnp.maximum(out, 0.0)
        o_ref[0] = out.reshape(H, W, Cout).astype(o_ref.dtype)

    # TODO(synk): add halo row-tiling over H for large images so the padded
    # slab fits v7x's 64 MiB VMEM and both TensorCores get work when B==1.
    return pl.pallas_call(
        kernel,
        out_shape=jax.ShapeDtypeStruct((B, H, W, Cout), out_dtype),
        grid=(B,),
        in_specs=[
            pl.BlockSpec((1, Hp, Wp, Cin), lambda b: (b, 0, 0, 0)),
            pl.BlockSpec((K * K * Cin, Cout), lambda b: (0, 0)),
            pl.BlockSpec((1, Cout), lambda b: (0, 0)),
        ],
        out_specs=pl.BlockSpec((1, H, W, Cout), lambda b: (b, 0, 0, 0)),
        compiler_params=pltpu.CompilerParams(dimension_semantics=("parallel",)),
    )


@functools.lru_cache(maxsize=None)
def _dwconv_fn(B, H, W, C, K, TB, out_dtype):
    """Depthwise KxK conv, NHWC, input pre-padded; TB batch items per step."""
    Hp, Wp = H + K - 1, W + K - 1

    def kernel(x_ref, w_ref, b_ref, o_ref):
        x = x_ref[...].astype(jnp.float32)                      # (TB, Hp, Wp, C)
        acc = jnp.zeros((TB, H, W, C), jnp.float32)
        for i in range(K):
            for j in range(K):
                acc = acc + x[:, i:i + H, j:j + W, :] * w_ref[i * K + j]
        o_ref[...] = (acc + b_ref[...]).astype(o_ref.dtype)

    return pl.pallas_call(
        kernel,
        out_shape=jax.ShapeDtypeStruct((B, H, W, C), out_dtype),
        grid=(B // TB,),
        in_specs=[
            pl.BlockSpec((TB, Hp, Wp, C), lambda b: (b, 0, 0, 0)),
            pl.BlockSpec((K * K, C), lambda b: (0, 0)),
            pl.BlockSpec((1, C), lambda b: (0, 0)),
        ],
        out_specs=pl.BlockSpec((TB, H, W, C), lambda b: (b, 0, 0, 0)),
        compiler_params=pltpu.CompilerParams(dimension_semantics=("parallel",)),
    )


@functools.lru_cache(maxsize=None)
def _attn_fn(BW, Nw, C, nh, scale, out_dtype):
    """Per-window multi-head attention with lepe add.

    Inputs/outputs are lane-dense (BW, Nw, C) slabs; the head split/merge is
    done in-kernel with lane slices / concat, softmax in f32, PV in bf16."""
    hd = C // nh
    TB = _batch_tile(BW, Nw * C * 4 * 4, budget=8 * 1024 * 1024)

    def kernel(q_ref, k_ref, v_ref, l_ref, o_ref):
        q = q_ref[...].astype(jnp.bfloat16)
        k = k_ref[...].astype(jnp.bfloat16)
        v = v_ref[...].astype(jnp.bfloat16)
        outs = []
        for h in range(nh):
            sl = slice(h * hd, (h + 1) * hd)
            s = jnp.einsum("bqd,bkd->bqk", q[..., sl], k[..., sl],
                           preferred_element_type=jnp.float32) * scale
            s = s - jnp.max(s, axis=-1, keepdims=True)
            e = jnp.exp(s)
            p = e * pl.reciprocal(jnp.sum(e, axis=-1, keepdims=True), approx=True)
            outs.append(jnp.einsum("bqk,bkd->bqd", p.astype(jnp.bfloat16),
                                   v[..., sl],
                                   preferred_element_type=jnp.float32))
        o = jnp.concatenate(outs, axis=-1) + l_ref[...].astype(jnp.float32)
        o_ref[...] = o.astype(o_ref.dtype)

    spec = pl.BlockSpec((TB, Nw, C), lambda i: (i, 0, 0))
    return pl.pallas_call(
        kernel,
        out_shape=jax.ShapeDtypeStruct((BW, Nw, C), out_dtype),
        grid=(BW // TB,),
        in_specs=[spec, spec, spec, spec],
        out_specs=spec,
        compiler_params=pltpu.CompilerParams(dimension_semantics=("parallel",)),
    )


# --------------------------------------------------------------------------
# JAX wrappers (model runs in NHWC internally; NCHW only at module boundary)
# --------------------------------------------------------------------------

def conv2d_nhwc(x, p, act="none", out_dtype=jnp.float32):
    """Dense KxK conv (pad=K//2) on NHWC. 1x1 -> direct matmul."""
    B, H, W, Cin = x.shape
    KK, _, Cout = p["w"].shape
    K = int(round(math.sqrt(KK)))
    if K == 1:
        out = matmul_bias_act(x.reshape(B * H * W, Cin),
                              p["w"].reshape(Cin, Cout), p["b"], act, out_dtype)
        return out.reshape(B, H, W, Cout)
    pad = K // 2
    xp = jnp.pad(x, ((0, 0), (pad, pad), (pad, pad), (0, 0)))
    wmat = p["w"].reshape(K * K * Cin, Cout)
    return _conv_fn(B, H, W, Cin, Cout, K, act, out_dtype)(xp, wmat, p["b"])


@functools.partial(jax.jit, static_argnames=("act",))
def conv_block(x, p, act="none"):
    return conv2d_nhwc(x, p, act=act)


def dwconv_nhwc(x, p, out_dtype=jnp.float32):
    """Depthwise KxK conv (groups=C, pad=K//2) on NHWC."""
    B, H, W, C = x.shape
    K = int(round(math.sqrt(p["w"].shape[0])))
    Hp, Wp = H + K - 1, W + K - 1
    pad = K // 2
    xp = jnp.pad(x, ((0, 0), (pad, pad), (pad, pad), (0, 0)))
    TB = _batch_tile(B, Hp * Wp * C * 4)
    return _dwconv_fn(B, H, W, C, K, TB, out_dtype)(xp, p["w"], p["b"])


def attention_core(q, k, v, lepe, scale, nh, out_dtype=jnp.bfloat16):
    BW, Nw, C = q.shape
    return _attn_fn(BW, Nw, C, nh, float(scale), out_dtype)(q, k, v, lepe)


# --------------------------------------------------------------------------
# Model blocks (faithful to the PyTorch forward semantics)
# --------------------------------------------------------------------------

@jax.jit
def resblock_forward(x, p):
    r = conv2d_nhwc(x, p["c1"], act="relu")
    r = conv2d_nhwc(r, p["c2"])
    return r + x                                              # res_scale = 1


def feedforward_forward(x, p, norm2):
    """FeedForward with norm2 fused into the 1x1 project_in matmul (NHWC)."""
    B, H, W, C = x.shape
    h2 = layernorm_matmul(x.reshape(B * H * W, C), norm2,
                          p["pin_w"], p["pin_b"], out_dtype=jnp.bfloat16)
    hid2 = h2.shape[1]
    hid = hid2 // 2
    hh = dwconv_nhwc(h2.reshape(B, H, W, hid2), p["dw"], out_dtype=jnp.bfloat16)
    x1 = hh[..., :hid].astype(jnp.float32)
    x2 = hh[..., hid:].astype(jnp.float32)
    # TODO(synk): exact-erf GELU gating kept in XLA glue (erf in Mosaic not guaranteed).
    g = jax.nn.gelu(x1, approximate=False) * x2
    out = matmul_bias_act(g.reshape(B * H * W, hid),
                          p["pout_w"], p["pout_b"], out_dtype=jnp.float32)
    return out.reshape(B, H, W, C)


def lepe_attention_forward(q, k, v, p, resolution, idx, num_heads):
    """LePEAttention on sequence-layout (B, N, C) inputs (split_size=1)."""
    B, N, C = q.shape
    H = W = resolution
    if idx == 0:
        H_sp, W_sp = resolution, 1
    else:
        H_sp, W_sp = 1, resolution
    Nw = H_sp * W_sp
    hd = C // num_heads
    scale = hd ** (-0.5)

    def win(t):                                               # (B,N,C)->(BW,Nw,C)
        t = t.reshape(B, H // H_sp, H_sp, W // W_sp, W_sp, C)
        t = jnp.transpose(t, (0, 1, 3, 2, 4, 5))
        return t.reshape(-1, Nw, C)

    qw, kw, vw = win(q), win(k), win(v)
    # get_lepe: depthwise 3x3 on each (H_sp, W_sp) window of v (all windows in
    # one grid step via the batch-tiled dwconv kernel).
    lepe = dwconv_nhwc(vw.reshape(-1, H_sp, W_sp, C), p["get_v"],
                       out_dtype=jnp.bfloat16).reshape(-1, Nw, C)
    o = attention_core(qw, kw, vw, lepe, scale, num_heads)    # (BW, Nw, C) bf16
    # windows2img
    o = o.reshape(B, H // H_sp, W // W_sp, H_sp, W_sp, C)
    o = jnp.transpose(o, (0, 1, 3, 2, 4, 5)).reshape(B, N, C)
    return o


def window_attention_forward(x, p, norm1, window_size, num_heads):
    """WindowAttention with norm1 fused into the qkv projection."""
    B, N, C = x.shape
    Ch = C // 2
    qkv = layernorm_matmul(x.reshape(B * N, C), norm1, p["wqkv"], p["bqkv"],
                           out_dtype=jnp.bfloat16).reshape(B, N, 3 * C)
    q, k, v = qkv[..., :C], qkv[..., C:2 * C], qkv[..., 2 * C:]
    x1 = lepe_attention_forward(q[..., :Ch], k[..., :Ch], v[..., :Ch],
                                p["attn0"], window_size, 0, num_heads // 2)
    x2 = lepe_attention_forward(q[..., Ch:], k[..., Ch:], v[..., Ch:],
                                p["attn1"], window_size, 1, num_heads // 2)
    att = jnp.concatenate([x1, x2], axis=2)                   # (B, N, C)
    # rearrange 'b n (g d) -> b n (d g)', g=4
    att = jnp.transpose(att.reshape(B, N, 4, C // 4), (0, 1, 3, 2)).reshape(B, N, C)
    out = matmul_bias_act(att.reshape(B * N, C), p["proj_w"], p["proj_b"],
                          out_dtype=jnp.float32)
    return out.reshape(B, N, C)


def ssmtda_forward(x, p, num_heads, window_size, shift_size):
    """SSMTDA block on NHWC input (LN is fused into the downstream matmuls;
    LN commutes with the roll / window-partition row permutations)."""
    B, H, W, C = x.shape
    ws = window_size
    shortcut = x
    xs = x
    if shift_size > 0:
        xs = jnp.roll(xs, shift=(-shift_size, -shift_size), axis=(1, 2))
    # window partition
    xw = xs.reshape(B, H // ws, ws, W // ws, ws, C)
    xw = jnp.transpose(xw, (0, 1, 3, 2, 4, 5)).reshape(-1, ws * ws, C)
    aw = window_attention_forward(xw, p["attns"], p["norm1"], ws, num_heads)
    # window reverse
    sx = aw.reshape(B, H // ws, W // ws, ws, ws, C)
    sx = jnp.transpose(sx, (0, 1, 3, 2, 4, 5)).reshape(B, H, W, C)
    if shift_size > 0:
        sx = jnp.roll(sx, shift=(shift_size, shift_size), axis=(1, 2))
    x = shortcut + sx
    mlp = feedforward_forward(x, p["mlp"], p["norm2"])
    return x + mlp


@functools.partial(jax.jit, static_argnums=(2, 3))
def smsblock_forward(x, p, window_size, num_head):
    out = x
    for i, bp in enumerate(p["blocks"]):
        shift = 0 if i % 2 == 0 else window_size // 2
        out = ssmtda_forward(out, bp, num_head, window_size, shift)
    return conv2d_nhwc(out, p["conv"]) + x


@jax.jit
def fusion_forward(x, p):
    h = dwconv_nhwc(x, p["dw"], out_dtype=jnp.bfloat16)       # depthwise 5x5
    return conv2d_nhwc(h, p["pw"])                            # 1x1 to n_feats


def smcswt_forward(x_nchw, P, ws1, ws2, ws3):
    y = x_nchw
    x = jnp.transpose(x_nchw, (0, 2, 3, 1))                   # NHWC
    x = conv_block(x, P["head1"])
    x = resblock_forward(x, P["head1_1"])
    x = smsblock_forward(x, P["head1_3"], ws1[0], 8)
    group1 = conv_block(resblock_forward(x, P["body1_1"]["res"]),
                        P["body1_1"]["conv"], act="relu")
    group2 = smsblock_forward(resblock_forward(x, P["body2_1"]["res"]),
                              P["body2_1"]["sms"], ws2[0], 8)
    group3 = smsblock_forward(conv_block(x, P["body3_1"]["conv"], act="relu"),
                              P["body3_1"]["sms"], ws3[0], 8)
    group2 = smsblock_forward(
        resblock_forward(fusion_forward(jnp.concatenate([group1, group2], -1),
                                        P["fusion2_1"]), P["body2_2"]["res"]),
        P["body2_2"]["sms"], ws2[1], 8)
    group3 = smsblock_forward(
        conv_block(fusion_forward(jnp.concatenate([group2, group3], -1),
                                  P["fusion3_1"]), P["body3_2"]["conv"], act="relu"),
        P["body3_2"]["sms"], ws3[1], 8)
    group1 = resblock_forward(smsblock_forward(group1, P["body1_2"]["sms"], ws1[1], 8),
                              P["body1_2"]["res"])
    group2 = smsblock_forward(fusion_forward(jnp.concatenate([group1, group2], -1),
                                             P["fusion2_2"]),
                              P["body2_3"], ws2[2], 8)
    group3 = smsblock_forward(fusion_forward(jnp.concatenate([group2, group3], -1),
                                             P["fusion3_2"]),
                              P["body3_3"], ws3[2], 32)
    group3 = smsblock_forward(fusion_forward(
        jnp.concatenate([group1, group2, group3], -1), P["fusion3_3"]),
        P["body3_4"], ws3[3], 8)
    out = conv_block(group3, P["tail"])
    return jnp.transpose(out, (0, 3, 1, 2)) + y


# --------------------------------------------------------------------------
# Deterministic parameter construction (synthetic weights, kernel layout)
# --------------------------------------------------------------------------

class ParamInit:
    def __init__(self, key):
        self._key = key
        self._n = 0

    def __call__(self, shape, scale=0.02):
        self._n += 1
        k = jax.random.fold_in(self._key, self._n)
        return scale * jax.random.normal(k, shape, dtype=jnp.float32)


def conv_params(init, cin, cout, k):
    # pre-materialized im2col layout: (K*K, Cin, Cout) bf16, bias (1, Cout) f32
    return {"w": init((k * k, cin, cout)).astype(jnp.bfloat16),
            "b": init((cout,), 0.01).reshape(1, cout)}


def dwconv_params(init, c, k):
    return {"w": init((k * k, c)), "b": init((c,), 0.01).reshape(1, c)}


def linear_params(init, cin, cout):
    # pre-materialized (in, out) bf16
    return {"w": init((cin, cout)).astype(jnp.bfloat16),
            "b": init((cout,), 0.01).reshape(1, cout)}


def layernorm_params(c):
    return {"g": jnp.ones((1, c), jnp.float32), "b": jnp.zeros((1, c), jnp.float32)}


def feedforward_params(init, dim):
    hidden = int(dim * 2.66)
    pin = linear_params(init, dim, hidden * 2)
    pout = linear_params(init, hidden, dim)
    return {"pin_w": pin["w"], "pin_b": pin["b"],
            "dw": dwconv_params(init, hidden * 2, 3),
            "pout_w": pout["w"], "pout_b": pout["b"]}


def window_attn_params(init, dim):
    qk = linear_params(init, dim, 2 * dim)
    v = linear_params(init, dim, dim)
    proj = linear_params(init, dim, dim)
    return {"wqkv": jnp.concatenate([qk["w"], v["w"]], axis=1),   # (dim, 3*dim)
            "bqkv": jnp.concatenate([qk["b"], v["b"]], axis=1),   # (1, 3*dim)
            "proj_w": proj["w"], "proj_b": proj["b"],
            "attn0": {"get_v": dwconv_params(init, dim // 2, 3)},
            "attn1": {"get_v": dwconv_params(init, dim // 2, 3)}}


def ssmtda_params(init, dim):
    return {"norm1": layernorm_params(dim), "norm2": layernorm_params(dim),
            "attns": window_attn_params(init, dim),
            "mlp": feedforward_params(init, dim)}


def smsblock_params(init, dim, depth):
    return {"blocks": [ssmtda_params(init, dim) for _ in range(depth)],
            "conv": conv_params(init, dim, dim, 3)}


def resblock_params(init, nf):
    return {"c1": conv_params(init, nf, nf, 3), "c2": conv_params(init, nf, nf, 3)}


def fusion_params(init, nf, k_in):
    return {"dw": dwconv_params(init, nf * k_in, 5),
            "pw": conv_params(init, nf * k_in, nf, 1)}


def smcswt_params(init, d1, d2, d3, n_feats=64, n_colors=1):
    return {
        "head1": conv_params(init, n_colors, n_feats, 3),
        "head1_1": resblock_params(init, n_feats),
        "head1_3": smsblock_params(init, n_feats, d1[0]),
        "body1_1": {"res": resblock_params(init, n_feats),
                    "conv": conv_params(init, n_feats, n_feats, 3)},
        "body1_2": {"sms": smsblock_params(init, n_feats, d1[1]),
                    "res": resblock_params(init, n_feats)},
        "body2_1": {"res": resblock_params(init, n_feats),
                    "sms": smsblock_params(init, n_feats, d2[0])},
        "fusion2_1": fusion_params(init, n_feats, 2),
        "body2_2": {"res": resblock_params(init, n_feats),
                    "sms": smsblock_params(init, n_feats, d2[1])},
        "fusion2_2": fusion_params(init, n_feats, 2),
        "body2_3": smsblock_params(init, n_feats, d2[2]),
        "body3_1": {"conv": conv_params(init, n_feats, n_feats, 3),
                    "sms": smsblock_params(init, n_feats, d3[0])},
        "fusion3_1": fusion_params(init, n_feats, 2),
        "body3_2": {"conv": conv_params(init, n_feats, n_feats, 3),
                    "sms": smsblock_params(init, n_feats, d3[1])},
        "fusion3_2": fusion_params(init, n_feats, 2),
        "body3_3": smsblock_params(init, n_feats, d3[2]),
        "fusion3_3": fusion_params(init, n_feats, 3),
        "body3_4": smsblock_params(init, n_feats, d3[3]),
        "tail": conv_params(init, n_feats, n_colors, 3),
    }


# --------------------------------------------------------------------------
# Main
# --------------------------------------------------------------------------

if __name__ == "__main__":
    # Small, consistent config: 8x8 grayscale input, window size 4, depth 1.
    ws1, d1 = (4, 4), (1, 1)
    ws2, d2 = (4, 4, 4), (1, 1, 1)
    ws3, d3 = (4, 4, 4, 4), (1, 1, 1, 1)

    init = ParamInit(jax.random.PRNGKey(1))
    params = smcswt_params(init, d1, d2, d3)

    x = jax.random.normal(jax.random.PRNGKey(0), (1, 1, 8, 8), jnp.float32)

    out = smcswt_forward(x, params, ws1, ws2, ws3)
    out = jax.block_until_ready(out)
    assert out.shape == x.shape and out.dtype == jnp.float32
    print("KERNEL_OK")
</pallas_src>

<mosaic_0001>
module attributes {stable_mosaic.version = 11 : i64} {
  func.func @kernel(%arg0: i32, %arg1: memref<1x10x10x1xf32, #tpu.memory_space<vmem>>, %arg2: memref<9x64xbf16, #tpu.memory_space<vmem>>, %arg3: memref<1x64xf32, #tpu.memory_space<vmem>>, %arg4: memref<1x8x8x64xf32, #tpu.memory_space<vmem>>) attributes {dimension_semantics = [#tpu.dimension_semantics<parallel>], iteration_bounds = array<i64: 1>, scalar_prefetch = 0 : i64, scratch_operands = 0 : i64, tpu.core_type = #tpu.core_type<tc>, window_params = [{transform_indices = @transform_0, window_bounds = array<i64: 1, 10, 10, 1>}, {pipeline_mode = #tpu.pipeline_mode<synchronous>, transform_indices = @transform_1, window_bounds = array<i64: 9, 64>}, {pipeline_mode = #tpu.pipeline_mode<synchronous>, transform_indices = @transform_2, window_bounds = array<i64: 1, 64>}, {transform_indices = @transform_3, window_bounds = array<i64: 1, 8, 8, 64>}]} {
    %c0 = arith.constant 0 : index
    %c0_0 = arith.constant 0 : index
    %c0_1 = arith.constant 0 : index
    %c0_2 = arith.constant 0 : index
    %0 = vector.load %arg1[%c0, %c0_0, %c0_1, %c0_2] : memref<1x10x10x1xf32, #tpu.memory_space<vmem>>, vector<1x10x10x1xf32>
    %1 = vector.shape_cast %0 : vector<1x10x10x1xf32> to vector<10x10x1xf32>
    %2 = vector.extract_strided_slice %1 {offsets = [0, 0, 0], sizes = [8, 8, 1], strides = [1, 1, 1]} : vector<10x10x1xf32> to vector<8x8x1xf32>
    %3 = vector.shape_cast %2 : vector<8x8x1xf32> to vector<64x1xf32>
    %4 = vector.extract_strided_slice %1 {offsets = [0, 1, 0], sizes = [8, 8, 1], strides = [1, 1, 1]} : vector<10x10x1xf32> to vector<8x8x1xf32>
    %5 = vector.shape_cast %4 : vector<8x8x1xf32> to vector<64x1xf32>
    %6 = vector.extract_strided_slice %1 {offsets = [0, 2, 0], sizes = [8, 8, 1], strides = [1, 1, 1]} : vector<10x10x1xf32> to vector<8x8x1xf32>
    %7 = vector.shape_cast %6 : vector<8x8x1xf32> to vector<64x1xf32>
    %8 = vector.extract_strided_slice %1 {offsets = [1, 0, 0], sizes = [8, 8, 1], strides = [1, 1, 1]} : vector<10x10x1xf32> to vector<8x8x1xf32>
    %9 = vector.shape_cast %8 : vector<8x8x1xf32> to vector<64x1xf32>
    %10 = vector.extract_strided_slice %1 {offsets = [1, 1, 0], sizes = [8, 8, 1], strides = [1, 1, 1]} : vector<10x10x1xf32> to vector<8x8x1xf32>
    %11 = vector.shape_cast %10 : vector<8x8x1xf32> to vector<64x1xf32>
    %12 = vector.extract_strided_slice %1 {offsets = [1, 2, 0], sizes = [8, 8, 1], strides = [1, 1, 1]} : vector<10x10x1xf32> to vector<8x8x1xf32>
    %13 = vector.shape_cast %12 : vector<8x8x1xf32> to vector<64x1xf32>
    %14 = vector.extract_strided_slice %1 {offsets = [2, 0, 0], sizes = [8, 8, 1], strides = [1, 1, 1]} : vector<10x10x1xf32> to vector<8x8x1xf32>
    %15 = vector.shape_cast %14 : vector<8x8x1xf32> to vector<64x1xf32>
    %16 = vector.extract_strided_slice %1 {offsets = [2, 1, 0], sizes = [8, 8, 1], strides = [1, 1, 1]} : vector<10x10x1xf32> to vector<8x8x1xf32>
    %17 = vector.shape_cast %16 : vector<8x8x1xf32> to vector<64x1xf32>
    %18 = vector.extract_strided_slice %1 {offsets = [2, 2, 0], sizes = [8, 8, 1], strides = [1, 1, 1]} : vector<10x10x1xf32> to vector<8x8x1xf32>
    %19 = vector.shape_cast %18 : vector<8x8x1xf32> to vector<64x1xf32>
    %20 = tpu.concatenate %3, %5, %7, %9, %11, %13, %15, %17, %19 in 1 : vector<64x1xf32>, vector<64x1xf32>, vector<64x1xf32>, vector<64x1xf32>, vector<64x1xf32>, vector<64x1xf32>, vector<64x1xf32>, vector<64x1xf32>, vector<64x1xf32> -> vector<64x9xf32>
    %21 = arith.truncf %20 : vector<64x9xf32> to vector<64x9xbf16>
    %c0_3 = arith.constant 0 : index
    %c0_4 = arith.constant 0 : index
    %22 = vector.load %arg2[%c0_3, %c0_4] : memref<9x64xbf16, #tpu.memory_space<vmem>>, vector<9x64xbf16>
    %cst = arith.constant dense<0.000000e+00> : vector<64x64xf32>
    %23 = tpu.matmul %21, %22, %cst {dimension_numbers = #tpu.dot_dimension_numbers<[1], [0], [0], [1], [0, 0, 1, 1], [], []>} : vector<64x9xbf16>, vector<9x64xbf16>, vector<64x64xf32> -> vector<64x64xf32>
    %c0_5 = arith.constant 0 : index
    %c0_6 = arith.constant 0 : index
    %24 = vector.load %arg3[%c0_5, %c0_6] : memref<1x64xf32, #tpu.memory_space<vmem>>, vector<1x64xf32>
    %25 = vector.broadcast %24 : vector<1x64xf32> to vector<64x64xf32>
    %26 = arith.addf %23, %25 : vector<64x64xf32>
    %27 = vector.shape_cast %26 : vector<64x64xf32> to vector<8x8x64xf32>
    %c0_7 = arith.constant 0 : index
    %c0_8 = arith.constant 0 : index
    %c0_9 = arith.constant 0 : index
    %c0_10 = arith.constant 0 : index
    %28 = vector.load %arg4[%c0_7, %c0_8, %c0_9, %c0_10] : memref<1x8x8x64xf32, #tpu.memory_space<vmem>>, vector<1x8x8x64xf32>
    %29 = vector.shape_cast %28 : vector<1x8x8x64xf32> to vector<8x8x64xf32>
    %30 = vector.shape_cast %27 : vector<8x8x64xf32> to vector<1x8x8x64xf32>
    tpu.vector_store %arg4[%c0_7, %c0_8, %c0_9, %c0_10], %30 {strides = array<i32>} : memref<1x8x8x64xf32, #tpu.memory_space<vmem>>, vector<1x8x8x64xf32>,
    return
  }
  func.func @transform_0(%arg0: i32) -> (i32, i32, i32, i32) {
    %c0_i32 = arith.constant 0 : i32
    %c0_i32_0 = arith.constant 0 : i32
    %c0_i32_1 = arith.constant 0 : i32
    %c0_i32_2 = arith.constant 0 : i32
    return %arg0, %c0_i32, %c0_i32_0, %c0_i32_1 : i32, i32, i32, i32
  }
  func.func @transform_1(%arg0: i32) -> (i32, i32) {
    %c0_i32 = arith.constant 0 : i32
    %c0_i32_0 = arith.constant 0 : i32
    %c0_i32_1 = arith.constant 0 : i32
    return %c0_i32, %c0_i32_0 : i32, i32
  }
  func.func @transform_2(%arg0: i32) -> (i32, i32) {
    %c0_i32 = arith.constant 0 : i32
    %c0_i32_0 = arith.constant 0 : i32
    %c0_i32_1 = arith.constant 0 : i32
    return %c0_i32, %c0_i32_0 : i32, i32
  }
  func.func @transform_3(%arg0: i32) -> (i32, i32, i32, i32) {
    %c0_i32 = arith.constant 0 : i32
    %c0_i32_0 = arith.constant 0 : i32
    %c0_i32_1 = arith.constant 0 : i32
    %c0_i32_2 = arith.constant 0 : i32
    return %arg0, %c0_i32, %c0_i32_0, %c0_i32_1 : i32, i32, i32, i32
  }
}

</mosaic_0001>

<bundles_post_ra>
// kernel: conv_block.1
= control target key start
LH: loop header
LB: loop body
LE: loop exit
PB: predicated region body
PF: predicated region fallthrough
CT: control target
= control target key end

     0   :  { %vm52_vm0 = vcmask 1046528   ;;  %s729_s17 = smov 1   ;;  %vm77_vm1 = vcmask 1045504   ;;  %s1100_s0 = inlined_call_operand.vmem [shape: f32[1,10,10,1], index: 0, kind: input, shape index: {}]   ;;  %s1101_s1 = inlined_call_operand.vmem [shape: bf16[9,64], index: 1, kind: input, shape index: {}]   ;;  %s1102_s2 = inlined_call_operand.vmem [shape: f32[1,64], index: 2, kind: input, shape index: {}]   ;;  %s1103_s3 = inlined_call_operand.hbm [shape: f32[1,8,8,64], index: 3, kind: output, shape index: {}]  }
   0x1   :  { %v763_v0 = vld [vmem:[%s1100_s0 + $0x20] sm:$0xff]  ;;  %v768_v1 = vld [vmem:[%s1100_s0 + $0x28] sm:$0x3]  ;;  %v773_v2 = vld [vmem:[%s1100_s0 + $0x30] sm:$0xff] }
   0x2   :  { %v778_v3 = vld [vmem:[%s1100_s0 + $0x38] sm:$0x3]  ;;  %v59_v4 = vrot.slane %v763_v0, 1  ;;  %v60_v5 = vrot.slane %v768_v1, 1  ;;  %v62_v6 = vrot.slane %v773_v2, 1  ;;  %v85_v7 = vrot.slane %v768_v1, 2 }
   0x3   :  { %v63_v8 = vrot.slane %v778_v3, 1  ;;  %v88_v9 = vrot.slane %v778_v3, 2  ;;  %v789_v10 = vld [vmem:[%s1100_s0 + $0x10] sm:$0xff]  ;;  %v19_v11 = vld [vmem:[%s1100_s0 + $0x18] sm:$0x3]  ;;  %v797_v12 = vld [vmem:[%s1100_s0] sm:$0xff] }
   0x4   :  { %v800_v13 = vsel %vm52_vm0, %v59_v4, %v60_v5  ;;  %v56_v14 = vrot.slane %v789_v10, 1  ;;  %v57_v15 = vrot.slane %v19_v11, 1  ;;  %v82_v16 = vrot.slane %v19_v11, 2  ;;  %v17_v17 = vld [vmem:[%s1100_s0 + $0x8] sm:$0x3]  ;;  %v809_v18 = vld [vmem:[%s1100_s0 + $0x60] sm:$0xff] }
   0x5   :  { %v812_v19 = vsel %vm52_vm0, %v62_v6, %v63_v8  ;;  %v53_v20 = vrot.slane %v797_v12, 1  ;;  %v54_v21 = vrot.slane %v17_v17, 1  ;;  %v79_v22 = vrot.slane %v17_v17, 2  ;;  %v29_v23 = vld [vmem:[%s1100_s0 + $0x68] sm:$0x3]  ;;  %v821_v24 = vld [vmem:[%s1100_s0 + $0x70] sm:$0xff] }
   0x6   :  { %v825_v25 = vpack.i.bf16 %v812_v19, %v800_v13  ;;  %v828_v26 = vsel %vm52_vm0, %v56_v14, %v57_v15  ;;  %v31_v27 = vld [vmem:[%s1100_s0 + $0x78] sm:$0x3]  ;;  %v71_v28 = vrot.slane %v809_v18, 1  ;;  %v72_v29 = vrot.slane %v29_v23, 1  ;;  %v837_v30 = vld [vmem:[%s1100_s0 + $0x40] sm:$0xff]  ;;  %v842_v31 = vld [vmem:[%s1100_s0 + $0x50] sm:$0xff] }
   0x7   :  { %v55_v32 = vsel %vm52_vm0, %v53_v20, %v54_v21  ;;  %v74_v33 = vrot.slane %v821_v24, 1  ;;  %v75_v34 = vrot.slane %v31_v27, 1  ;;  %v25_v35 = vld [vmem:[%s1100_s0 + $0x48] sm:$0x3]  ;;  %v27_v36 = vld [vmem:[%s1100_s0 + $0x58] sm:$0x3] }
   0x8   :  { %555 = vrot.lane.b32.xlu1 %v825_v25, %s729_s17  ;;  %v544_v37 = vpack.i.bf16 %v828_v26, %v55_v32  ;;  %v73_v38 = vsel %vm52_vm0, %v71_v28, %v72_v29  ;;  %v65_v39 = vrot.slane %v837_v30, 1  ;;  %v66_v40 = vrot.slane %v25_v35, 1 }
   0x9   :  { %v857_v41 = vsel %vm52_vm0, %v74_v33, %v75_v34  ;;  %v68_v42 = vrot.slane %v842_v31, 1  ;;  %v69_v43 = vrot.slane %v27_v36, 1  ;;  %v90_v46 = vrot.slane %v837_v30, 2 }
   0xa   :  { %545 = vrot.lane.b32.xlu0 %v544_v37, %s729_s17  ;;  %v861_v44 = vpack.i.bf16 %v857_v41, %v73_v38  ;;  %v67_v45 = vsel %vm52_vm0, %v65_v39, %v66_v40  ;;  %v91_v47 = vrot.slane %v25_v35, 2  ;;  %v93_v49 = vrot.slane %v842_v31, 2 }
   0xb   :  { %v70_v48 = vsel %vm52_vm0, %v68_v42, %v69_v43  ;;  %v94_v50 = vrot.slane %v27_v36, 2  ;;  %v78_v51 = vrot.slane %v797_v12, 2  ;;  %v81_v54 = vrot.slane %v789_v10, 2 }
   0xc   :  { %560 = vrot.lane.b32.xlu1 %v861_v44, %s729_s17  ;;  %v869_v52 = vpack.i.bf16 %v70_v48, %v67_v45  ;;  %v92_v53 = vsel %vm77_vm1, %v90_v46, %v91_v47  ;;  %v96_v55 = vrot.slane %v809_v18, 2  ;;  %v97_v58 = vrot.slane %v29_v23, 2 }
   0xd   :  { %v95_v56 = vsel %vm77_vm1, %v93_v49, %v94_v50  ;;  %v80_v57 = vsel %vm77_vm1, %v78_v51, %v79_v22  ;;  %v99_v59 = vrot.slane %v821_v24, 2 }
   0xe   :  { %8 = vsyncpa [#allocation3], 0  ;;  %550 = vrot.lane.b32.xlu0 %v869_v52, %s729_s17  ;;  %v878_v60 = vpack.i.bf16 %v95_v56, %v92_v53  ;;  %v83_v61 = vsel %vm77_vm1, %v81_v54, %v82_v16  ;;  %v100_v62 = vrot.slane %v31_v27, 2  ;;  %v84_v63 = vrot.slane %v763_v0, 2  ;;  %s730_s18 = smov 2   ;;  %v32_v1 = vld [vmem:[%s1100_s0 + $0x80] sm:$0xff] }
   0xf   :  { %v564_v4 = vpack.i.bf16 %v83_v61, %v80_v57  ;;  %v98_v5 = vsel %vm77_vm1, %v96_v55, %v97_v58  ;;  %v87_v6 = vrot.slane %v773_v2, 2  ;;  %v589_v17 = vpack.i.bf16 %v809_v18, %v842_v31  ;;  %v33_v3 = vld [vmem:[%s1100_s0 + $0x88] sm:$0x3]  ;;  %s731_s23 = smov 3   ;;  %s732_s24 = smov 4   ;;  %v34_v39 = vld [vmem:[%s1100_s0 + $0x90] sm:$0xff] }
  0x10   :  { %570 = vrot.lane.b32.xlu1 %v878_v60, %s730_s18  ;;  %v101_v8 = vsel %vm77_vm1, %v99_v59, %v100_v62  ;;  %v86_v11 = vsel %vm77_vm1, %v84_v63, %v85_v7  ;;  %v584_v7 = vpack.i.bf16 %v763_v0, %v789_v10  ;;  %v104_v20 = vrot.slane %v32_v1, 1  ;;  %s733_s25 = smov 5   ;;  %v35_v40 = vld [vmem:[%s1100_s0 + $0x98] sm:$0x3]  ;;  %s734_s30 = smov 6  }
  0x11   :  { %v889_v14 = vpack.i.bf16 %v101_v8, %v98_v5  ;;  %v89_v15 = vsel %vm77_vm1, %v87_v6, %v88_v9  ;;  %v599_v9 = vpack.i.bf16 %v32_v1, %v821_v24  ;;  %v105_v21 = vrot.slane %v33_v3, 1  ;;  %v704_v47 = vld [vmem:[%s1101_s1] sm:$0x1f]   ;;  %s736_s0 = smov 7   ;;  %s737_s1 = smov 8  }
  0x12   :  { %565 = vrot.lane.b32.xlu0 %v564_v4, %s730_s18  ;;  %v894_v16 = vpack.i.bf16 %v89_v15, %v86_v11  ;;  %v594_v22 = vpack.i.bf16 %v837_v30, %v773_v2  ;;  %v609_v23 = vpack.i.bf16 %v73_v38, %v70_v48  ;;  %v604_v28 = vpack.i.bf16 %v800_v13, %v828_v26  ;;  %s738_s8 = smov [#allocation2]  }
  0x13   :  { %v106_v27 = vsel %vm52_vm0, %v104_v20, %v105_v21  ;;  %v107_v32 = vrot.slane %v32_v1, 2  ;;  %v108_v33 = vrot.slane %v33_v3, 2  ;;  %v614_v34 = vpack.i.bf16 %v67_v45, %v812_v19  ;;  %s499_s9 = sshll.u32 %s738_s8, 4  ;;  %s500_s9 = int_to_ptr.vmem [resolvable:$true] %s499_s9 }
  0x14   :  { %580 = vrot.lane.b32.xlu1 %v889_v14, %s730_s18  ;;  %v619_v29 = vpack.i.bf16 %v106_v27, %v857_v41  ;;  %v629_v35 = vpack.i.bf16 %v98_v5, %v95_v56  ;;  %v624_v37 = vpack.i.bf16 %v86_v11, %v83_v61  ;;  %v634_v13 = vpack.i.bf16 %v92_v53, %v89_v15  ;;  %p710_p1 = scmp.lt.s32.totalorder %s500_s9, %s500_s9 }
  0x15   :  { %v109_v36 = vsel %vm77_vm1, %v107_v32, %v108_v33  ;;  %v649_v26 = vpack.i.bf16 %v821_v24, %v809_v18  ;;  %v644_v19 = vpack.i.bf16 %v773_v2, %v763_v0  ;;  %v659_v41 = vpack.i.bf16 %v34_v39, %v32_v1 }
  0x16   :  { %575 = vrot.lane.b32.xlu0 %v894_v16, %s730_s18  ;;  %v639_v38 = vpack.i.bf16 %v109_v36, %v101_v8  ;;  %v112_v42 = vrot.slane %v34_v39, 1  ;;  %v113_v43 = vrot.slane %v35_v40, 1  ;;  %v654_v45 = vpack.i.bf16 %v842_v31, %v837_v30 }
  0x17   :  { %vm413_vm2 = vcmask 1043456   ;;  %vm414_vm3 = vcmask 1044480   ;;  %v735_v48 = vmov 65535   ;;  %v115_v54 = vrot.slane %v34_v39, 2 }
  0x18   :  { %590 = vrot.lane.b32.xlu1 %v589_v17, %s731_s23  ;;  %v114_v46 = vsel %vm52_vm0, %v112_v42, %v113_v43  ;;  %v415_v49 = vsel %vm413_vm2, 4294967295, %v735_v48  ;;  %v116_v55 = vrot.slane %v35_v40, 2  ;;  %vm310_vm4 = vcmask 7168  }
  0x19   :  { %v416_v50 = vsel %vm414_vm3, %v415_v49, 0  ;;  %v679_v51 = vpack.i.bf16 %v114_v46, %v106_v27  ;;  %vm319_vm5 = vcmask 15360   ;;  %vm328_vm6 = vcmask 23552  }
  0x1a   :  { %585 = vrot.lane.b32.xlu0 %v584_v7, %s731_s23  ;;  %v418_v53 = vand.u32 %v704_v47, %v416_v50  ;;  %v117_v56 = vsel %vm77_vm1, %v115_v54, %v116_v55  ;;  %vm337_vm7 = vcmask 31744   ;;  %vm346_vm8 = vcmask 39936  }
  0x1b   :  { %vm355_vm9 = vcmask 48128   ;;  %vm364_vm10 = vcmask 56320   ;;  %vm373_vm11 = vcmask 64512   ;;  %vm400_vm12 = vcmask 72704  }
  0x1c   :  { %600 = vrot.lane.b32.xlu1 %v599_v9, %s731_s23  ;;  %521 = vmatprep.subr.bf16.mxu0 %v418_v53  ;;  %vm485_vm13 = vcmask 523264  }
  0x1d   :  { %531 = vmatprep.subr.bf16.mxu1 %v418_v53  ;;  %522 = vmatpush3.bf16.msra.mxu0 %v418_v53 }
  0x1e   :  { %595 = vrot.lane.b32.xlu0 %v594_v22, %s731_s23  ;;  %532 = vmatpush3.bf16.msra.mxu1 %v418_v53 }
  0x20   :  { %610 = vrot.lane.b32.xlu1 %v609_v23, %s732_s24 }
  0x22   :  { %605 = vrot.lane.b32.xlu0 %v604_v28, %s732_s24 }
  0x24   :  { %620 = vrot.lane.b32.xlu1 %v619_v29, %s732_s24 }
  0x26   :  { %615 = vrot.lane.b32.xlu0 %v614_v34, %s732_s24 }
  0x28   :  { %630 = vrot.lane.b32.xlu1 %v629_v35, %s733_s25 }
  0x2a   :  { %625 = vrot.lane.b32.xlu0 %v624_v37, %s733_s25 }
  0x2c   :  { %640 = vrot.lane.b32.xlu1 %v639_v38, %s733_s25 }
  0x2e   :  { %635 = vrot.lane.b32.xlu0 %v634_v13, %s733_s25 }
  0x30   :  { %650 = vrot.lane.b32.xlu1 %v649_v26, %s734_s30 }
  0x32   :  { %645 = vrot.lane.b32.xlu0 %v644_v19, %s734_s30 }
  0x34   :  { %660 = vrot.lane.b32.xlu1 %v659_v41, %s734_s30 }
  0x36   :  { %655 = vrot.lane.b32.xlu0 %v654_v45, %s734_s30 }
  0x38   :  { %670 = vrot.lane.b32.xlu1 %v861_v44, %s736_s0  ;;  %v699_v44 = vpack.i.bf16 %v117_v56, %v109_v36 }
  0x3a   :  { %665 = vrot.lane.b32.xlu0 %v825_v25, %s736_s0 }
  0x3c   :  { %680 = vrot.lane.b32.xlu1 %v679_v51, %s736_s0 }
  0x3e   :  { %675 = vrot.lane.b32.xlu0 %v869_v52, %s736_s0 }
  0x40   :  { %690 = vrot.lane.b32.xlu1 %v889_v14, %s737_s1 }
  0x42   :  { %685 = vrot.lane.b32.xlu0 %v894_v16, %s737_s1 }
  0x44   :  { %700 = vrot.lane.b32.xlu1 %v699_v44, %s737_s1 }
  0x46   :  { %695 = vrot.lane.b32.xlu0 %v878_v60, %s737_s1 }
  0x7a   :  { %v556_v25 = vpop.permute.xlu1 %555 }
  0x7b   :  { %v558_v15 = vunpack.i.h.bf16 %v556_v25  ;;  %v557_v16 = vunpack.i.l.bf16 %v556_v25 }
  0x7c   :  { %v546_v57 = vpop.permute.xlu0 %545 }
  0x7d   :  { %v548_v1 = vunpack.i.h.bf16 %v546_v57  ;;  %v547_v7 = vunpack.i.l.bf16 %v546_v57  ;;  %v314_v21 = vsel %vm310_vm4, %v773_v2, %v558_v15  ;;  %v313_v22 = vsel %vm310_vm4, %v763_v0, %v557_v16 }
  0x7e   :  { %v561_v58 = vpop.permute.xlu1 %560 }
  0x7f   :  { %v563_v9 = vunpack.i.h.bf16 %v561_v58  ;;  %v562_v20 = vunpack.i.l.bf16 %v561_v58  ;;  %v312_v35 = vsel %vm310_vm4, %v789_v10, %v548_v1  ;;  %v311_v36 = vsel %vm310_vm4, %v797_v12, %v547_v7 }
  0x80   :  { %v551_v59 = vpop.permute.xlu0 %550 }
  0x81   :  { %v553_v23 = vunpack.i.h.bf16 %v551_v59  ;;  %v552_v27 = vunpack.i.l.bf16 %v551_v59  ;;  %v318_v0 = vsel %vm310_vm4, %v821_v24, %v563_v9  ;;  %v317_v13 = vsel %vm310_vm4, %v809_v18, %v562_v20 }
  0x82   :  { %v571_v61 = vpop.permute.xlu1 %570 }
  0x83   :  { %v573_v29 = vunpack.i.h.bf16 %v571_v61  ;;  %v572_v32 = vunpack.i.l.bf16 %v571_v61  ;;  %v316_v19 = vsel %vm310_vm4, %v842_v31, %v553_v23  ;;  %v315_v10 = vsel %vm310_vm4, %v837_v30, %v552_v27 }
  0x84   :  { %v566_v62 = vpop.permute.xlu0 %565 }
  0x85   :  { %v568_v33 = vunpack.i.h.bf16 %v566_v62  ;;  %v567_v34 = vunpack.i.l.bf16 %v566_v62  ;;  %v324_v42 = vsel %vm319_vm5, %v315_v10, %v572_v32  ;;  %v325_v43 = vsel %vm319_vm5, %v316_v19, %v573_v29 }
  0x86   :  { %v581_v52 = vpop.permute.xlu1 %580 }
  0x87   :  { %v583_v37 = vunpack.i.h.bf16 %v581_v52  ;;  %v582_v38 = vunpack.i.l.bf16 %v581_v52  ;;  %v320_v24 = vsel %vm319_vm5, %v311_v36, %v567_v34  ;;  %v321_v18 = vsel %vm319_vm5, %v312_v35, %v568_v33 }
  0x88   :  { %v576_v63 = vpop.permute.xlu0 %575 }
  0x89   :  { %v578_v26 = vunpack.i.h.bf16 %v576_v63  ;;  %v577_v39 = vunpack.i.l.bf16 %v576_v63  ;;  %v326_v45 = vsel %vm319_vm5, %v317_v13, %v582_v38  ;;  %v327_v31 = vsel %vm319_vm5, %v318_v0, %v583_v37 }
  0x8a   :  { %v591_v4 = vpop.permute.xlu1 %590 }
  0x8b   :  { %v593_v12 = vunpack.i.h.bf16 %v591_v4  ;;  %v592_v40 = vunpack.i.l.bf16 %v591_v4  ;;  %v323_v48 = vsel %vm319_vm5, %v314_v21, %v578_v26  ;;  %v322_v49 = vsel %vm319_vm5, %v313_v22, %v577_v39 }
  0x8c   :  { %v944_v5 = vpop.permute.xlu0 %585 }
  0x8d   :  { %v588_v46 = vunpack.i.h.bf16 %v944_v5  ;;  %v587_v30 = vunpack.i.l.bf16 %v944_v5  ;;  %v333_v53 = vsel %vm328_vm6, %v324_v42, %v592_v40  ;;  %v334_v54 = vsel %vm328_vm6, %v325_v43, %v593_v12 }
  0x8e   :  { %v946_v6 = vpop.permute.xlu1 %600 }
  0x8f   :  { %v603_v50 = vunpack.i.h.bf16 %v946_v6  ;;  %v602_v51 = vunpack.i.l.bf16 %v946_v6  ;;  %v329_v61 = vsel %vm328_vm6, %v320_v24, %v587_v30  ;;  %v330_v62 = vsel %vm328_vm6, %v321_v18, %v588_v46 }
  0x90   :  { %v948_v8 = vpop.permute.xlu0 %595 }
  0x91   :  { %v598_v55 = vunpack.i.h.bf16 %v948_v8  ;;  %v597_v56 = vunpack.i.l.bf16 %v948_v8  ;;  %v335_v5 = vsel %vm328_vm6, %v326_v45, %v602_v51  ;;  %v336_v6 = vsel %vm328_vm6, %v327_v31, %v603_v50 }
  0x92   :  { %v950_v11 = vpop.permute.xlu1 %610 }
  0x93   :  { %v613_v25 = vunpack.i.h.bf16 %v950_v11  ;;  %v612_v57 = vunpack.i.l.bf16 %v950_v11  ;;  %v332_v15 = vsel %vm328_vm6, %v323_v48, %v598_v55 }
  0x94   :  { %v952_v14 = vpop.permute.xlu0 %605 }
  0x95   :  { %v608_v58 = vunpack.i.h.bf16 %v952_v14  ;;  %v607_v59 = vunpack.i.l.bf16 %v952_v14  ;;  %v331_v14 = vsel %vm328_vm6, %v322_v49, %v597_v56  ;;  %v343_v9 = vsel %vm337_vm7, %v334_v54, %v613_v25 }
  0x96   :  { %v954_v60 = vpop.permute.xlu1 %620 }
  0x97   :  { %v623_v52 = vunpack.i.h.bf16 %v954_v60  ;;  %v622_v63 = vunpack.i.l.bf16 %v954_v60  ;;  %v342_v60 = vsel %vm337_vm7, %v333_v53, %v612_v57  ;;  %v338_v20 = vsel %vm337_vm7, %v329_v61, %v607_v59 }
  0x98   :  { %v956_v17 = vpop.permute.xlu0 %615  ;;  %v339_v21 = vsel %vm337_vm7, %v330_v62, %v608_v58 }
  0x99   :  { %v618_v8 = vunpack.i.h.bf16 %v956_v17  ;;  %v617_v11 = vunpack.i.l.bf16 %v956_v17  ;;  %v344_v17 = vsel %vm337_vm7, %v335_v5, %v622_v63  ;;  %v345_v22 = vsel %vm337_vm7, %v336_v6, %v623_v52 }
  0x9a   :  { %v958_v3 = vpop.permute.xlu1 %630 }
  0x9b   :  { %v633_v16 = vunpack.i.h.bf16 %v958_v3  ;;  %v632_v1 = vunpack.i.l.bf16 %v958_v3  ;;  %v340_v29 = vsel %vm337_vm7, %v331_v14, %v617_v11  ;;  %v341_v32 = vsel %vm337_vm7, %v332_v15, %v618_v8 }
  0x9c   :  { %v964_v28 = vpop.permute.xlu0 %625 }
  0x9d   :  { %v628_v23 = vunpack.i.h.bf16 %v964_v28  ;;  %v627_v27 = vunpack.i.l.bf16 %v964_v28  ;;  %v351_v35 = vsel %vm346_vm8, %v342_v60, %v632_v1  ;;  %v352_v36 = vsel %vm346_vm8, %v343_v9, %v633_v16 }
  0x9e   :  { %v970_v2 = vpop.permute.xlu1 %640 }
  0x9f   :  { %v643_v33 = vunpack.i.h.bf16 %v970_v2  ;;  %v642_v34 = vunpack.i.l.bf16 %v970_v2  ;;  %v347_v2 = vsel %vm346_vm8, %v338_v20, %v627_v27  ;;  %v348_v19 = vsel %vm346_vm8, %v339_v21, %v628_v23 }
  0xa0   :  { %v980_v41 = vpop.permute.xlu0 %635 }
  0xa1   :  { %v638_v37 = vunpack.i.h.bf16 %v980_v41  ;;  %v637_v38 = vunpack.i.l.bf16 %v980_v41  ;;  %v353_v42 = vsel %vm346_vm8, %v344_v17, %v642_v34  ;;  %v354_v41 = vsel %vm346_vm8, %v345_v22, %v643_v33 }
  0xa2   :  { %v990_v47 = vpop.permute.xlu1 %650 }
  0xa3   :  { %v653_v28 = vunpack.i.h.bf16 %v990_v47  ;;  %v652_v13 = vunpack.i.l.bf16 %v990_v47  ;;  %v349_v18 = vsel %vm346_vm8, %v340_v29, %v637_v38  ;;  %v350_v45 = vsel %vm346_vm8, %v341_v32, %v638_v37 }
  0xa4   :  { %v1000_v44 = vpop.permute.xlu0 %645 }
  0xa5   :  { %v648_v26 = vunpack.i.h.bf16 %v1000_v44  ;;  %v647_v39 = vunpack.i.l.bf16 %v1000_v44  ;;  %v360_v47 = vsel %vm355_vm9, %v351_v35, %v652_v13  ;;  %v361_v48 = vsel %vm355_vm9, %v352_v36, %v653_v28  ;;  %v510_v28 = vld [vmem:[%s1102_s2] ss:$0 sm:$0xff]  ;;  %s705_s2 = scalar_lea.vmem %s500_s9, 1024 }
  0xa6   :  { %v661_v4 = vpop.permute.xlu1 %660  ;;  %p706_p0 = scmp.ne.s32.totalorder %s500_s9, %s705_s2  ;;  %p711_p2 = scmp.lt.s32.totalorder %s705_s2, %s705_s2 }
  0xa7   :  { %v663_v10 = vunpack.i.h.bf16 %v661_v4  ;;  %v662_v12 = vunpack.i.l.bf16 %v661_v4  ;;  %v356_v49 = vsel %vm355_vm9, %v347_v2, %v647_v39  ;;  %v357_v50 = vsel %vm355_vm9, %v348_v19, %v648_v26 }
  0xa8   :  { %v1018_v7 = vpop.permute.xlu0 %655  ;;  %p712_p3 = por %p711_p2, %p710_p1 }
  0xa9   :  { %v657_v43 = vunpack.i.l.bf16 %v1018_v7  ;;  %v362_v51 = vsel %vm355_vm9, %v353_v42, %v662_v12  ;;  %v363_v53 = vsel %vm355_vm9, %v354_v41, %v663_v10  ;;  %v658_v54 = vunpack.i.h.bf16 %v1018_v7 }
  0xaa   :  { %v671_v3 = vpop.permute.xlu1 %670  ;;  %p713_p4 = pnand %p712_p3, %p706_p0 }
  0xab   :  { %v672_v24 = vunpack.i.l.bf16 %v671_v3  ;;  %v673_v31 = vunpack.i.h.bf16 %v671_v3  ;;  %v358_v44 = vsel %vm355_vm9, %v349_v18, %v657_v43  ;;  %v359_v21 = vsel %vm355_vm9, %v350_v45, %v658_v54 }
  0xac   :  { %v666_v0 = vpop.permute.xlu0 %665 }
  0xad   :  { %v667_v46 = vunpack.i.l.bf16 %v666_v0  ;;  %v668_v55 = vunpack.i.h.bf16 %v666_v0  ;;  %v369_v58 = vsel %vm364_vm10, %v360_v47, %v672_v24  ;;  %v370_v63 = vsel %vm364_vm10, %v361_v48, %v673_v31 }
  0xae   :  { %v681_v40 = vpop.permute.xlu1 %680 }
  0xaf   :  { %v683_v59 = vunpack.i.h.bf16 %v681_v40  ;;  %v682_v61 = vunpack.i.l.bf16 %v681_v40  ;;  %v365_v52 = vsel %vm364_vm10, %v356_v49, %v667_v46  ;;  %v366_v16 = vsel %vm364_vm10, %v357_v50, %v668_v55 }
  0xb0   :  { %v676_v30 = vpop.permute.xlu0 %675 }
  0xb1   :  { %v678_v11 = vunpack.i.h.bf16 %v676_v30  ;;  %v677_v14 = vunpack.i.l.bf16 %v676_v30  ;;  %v371_v17 = vsel %vm364_vm10, %v362_v51, %v682_v61  ;;  %v372_v22 = vsel %vm364_vm10, %v363_v53, %v683_v59 }
  0xb2   :  { %v691_v56 = vpop.permute.xlu1 %690 }
  0xb3   :  { %v693_v25 = vunpack.i.h.bf16 %v691_v56  ;;  %v692_v57 = vunpack.i.l.bf16 %v691_v56  ;;  %v367_v34 = vsel %vm364_vm10, %v358_v44, %v677_v14  ;;  %v368_v35 = vsel %vm364_vm10, %v359_v21, %v678_v11 }
  0xb4   :  { %v686_v62 = vpop.permute.xlu0 %685 }
  0xb5   :  { %v688_v4 = vunpack.i.h.bf16 %v686_v62  ;;  %v687_v5 = vunpack.i.l.bf16 %v686_v62  ;;  %v378_v6 = vsel %vm373_vm11, %v369_v58, %v692_v57  ;;  %v379_v8 = vsel %vm373_vm11, %v370_v63, %v693_v25 }
  0xb6   :  { %v701_v15 = vpop.permute.xlu1 %700  ;;  %v384_v1 = vpack.c.bf16 %v379_v8, %v378_v6 }
  0xb7   :  { %v703_v7 = vunpack.i.h.bf16 %v701_v15  ;;  %v702_v60 = vunpack.i.l.bf16 %v701_v15  ;;  %v374_v9 = vsel %vm373_vm11, %v365_v52, %v687_v5  ;;  %v375_v20 = vsel %vm373_vm11, %v366_v16, %v688_v4 }
  0xb8   :  { %v696_v23 = vpop.permute.xlu0 %695  ;;  %v382_v27 = vpack.c.bf16 %v375_v20, %v374_v9  ;;  %527 = vmatprep.mubr.msk.bf16.mxu1 %vm400_vm12, %v384_v1 }
  0xb9   :  { %v380_v3 = vsel %vm373_vm11, %v371_v17, %v702_v60  ;;  %v381_v29 = vsel %vm373_vm11, %v372_v22, %v703_v7  ;;  %v698_v32 = vunpack.i.h.bf16 %v696_v23  ;;  %v697_v33 = vunpack.i.l.bf16 %v696_v23 }
  0xba   :  { %v385_v36 = vpack.c.bf16 %v381_v29, %v380_v3  ;;  %523 = vmatprep.mubr.msk.bf16.mxu0 %vm400_vm12, %v382_v27 }
  0xbb   :  { %v376_v37 = vsel %vm373_vm11, %v367_v34, %v697_v33  ;;  %v377_v38 = vsel %vm373_vm11, %v368_v35, %v698_v32 }
  0xbc   :  { %v383_v0 = vpack.c.bf16 %v377_v38, %v376_v37  ;;  %528 = vmatmul.mubr.msk.bf16.vlgmr.msra.gmra.mrb[0].mxu1 %vm400_vm12, %v385_v36 }
  0xbe   :  { %524 = vmatmul.mubr.msk.bf16.vlgmr.msra.gmra.mrb[0].mxu0 %vm400_vm12, %v383_v0 }
 0x18f   :  { %v529_v13 = vpop.f32.mrb[0].mxu1 }
 0x190   :  { %v479_v26 = vadd.f32 %v529_v13, %v510_v28  ;;  %v470_v39 = vpop.f32.mrb[1].mxu1 }
 0x191   :  { %v525_v2 = vpop.f32.mrb[0].mxu0  ;;  %v471_v19 = vadd.f32 %v510_v28, %v470_v39  ;;  %v530_v10 = vpop.f32.mrb[2].mxu1 }
 0x192   :  { %v463_v12 = vadd.f32 %v525_v2, %v510_v28  ;;  %492 = vst.msk [vmem:[#allocation2 + $0x30] sm:$0xff] %vm485_vm13, %v479_v26  ;;  %v454_v40 = vpop.f32.mrb[1].mxu0  ;;  %v482_v42 = vadd.f32 %v530_v10, %v510_v28  ;;  %v473_v41 = vpop.f32.mrb[3].mxu1 }
 0x193   :  { %v455_v43 = vadd.f32 %v510_v28, %v454_v40  ;;  %490 = vst.msk [vmem:[#allocation2 + $0x20] sm:$0xff] %vm485_vm13, %v471_v19  ;;  %v526_v24 = vpop.f32.mrb[2].mxu0  ;;  %v474_v18 = vadd.f32 %v510_v28, %v473_v41 }
 0x194   :  { %488 = vst.msk [vmem:[#allocation2 + $0x10] sm:$0xff] %vm485_vm13, %v463_v12  ;;  %v466_v45 = vadd.f32 %v526_v24, %v510_v28  ;;  %493 = vst.msk [vmem:[#allocation2 + $0x38] sm:$0xff] %vm485_vm13, %v482_v42  ;;  %v457_v31 = vpop.f32.mrb[3].mxu0 }
 0x195   :  { %486 = vst.msk [vmem:[#allocation2] sm:$0xff] %vm485_vm13, %v455_v43  ;;  %v458_v46 = vadd.f32 %v510_v28, %v457_v31  ;;  %491 = vst.msk [vmem:[#allocation2 + $0x28] sm:$0xff] %vm485_vm13, %v474_v18 }
 0x196   :  { %489 = vst.msk [vmem:[#allocation2 + $0x18] sm:$0xff] %vm485_vm13, %v466_v45 }
 0x197   :  { %487 = vst.msk [vmem:[#allocation2 + $0x8] sm:$0xff] %vm485_vm13, %v458_v46 }
 0x198   :  { %716 = shalt.err (!%p713_p4)
}
 0x199   :  { %s717_s12 = scalar_lea.hbm %s1103_s3, 1024 }
 0x19a   :  { %p718_p5 = scmp.ne.s32.totalorder %s1103_s3, %s717_s12  ;;  %p721_p6 = scmp.lt.u32.totalorder %s717_s12, %s1103_s3 }
 0x19c   :  { %p723_p7 = pnand %p721_p6, %p718_p5 }
 0x19e   :  { %726 = shalt.err (!%p723_p7)
}
 0x19f   :  { %s739_s17 = smov 128  }
 0x1a0   :  { %505 = dma.vmem_to_hbm [thread:$0]  %s500_s9, 1024, %s1103_s3, [#allocation3], %s739_s17, %s739_s17, %s737_s1  }
 0x1a1   :  { %727 = dma.done.wait [#allocation3], 1024  }
 0x1a2   :  { %728 = vsyncadd [#allocation3], 4294966272 }
 0x1a3   :  { %509 = vsyncpa [#allocation3], 1 }

</bundles_post_ra>
